<compile_context>
chip_gen: v6e
topology: v6e:2x2x1
jax: 0.10.0
libtpu: 0.0.40
codegen_flags: <defaults>
</compile_context>

<pallas_src>
import jax
import jax.numpy as jnp
from jax.experimental import pallas as pl
from jax.experimental.pallas import tpu as pltpu


def temporal_kernel(m_ref, wbd_ref, en_ref, q_ref, qt_ref, x_ref, o_ref):
    # m_ref  : (R, N)    combined seq-mask * (1/set_size) per (batch*time) row
    # wbd_ref: (R, R)    block-diagonal kron(I_bb, W) (time-mix across the whole block)
    # en_ref : (N, NF)   E_n[n, k] = 1 iff k // F == n   (mask expansion)
    # q_ref  : (NF, F)   Q[k, f]  = 1 iff k %  F == f    (set-slot reduction)
    # qt_ref : (F, NF)   Q^T                              (broadcast back over slots)
    # x_ref  : (R, NF)   lane-dense input block (R = bb*T rows)
    # o_ref  : (R, NF)   lane-dense output block
    x = x_ref[...].astype(jnp.float32)                                             # (R, NF)
    # mask expansion: m_exp[r, k] = m[r, k // F]  (tiny MXU matmul, K = N)
    m_exp = jnp.dot(m_ref[...], en_ref[...], preferred_element_type=jnp.float32)   # (R, NF)
    masked = m_exp * x                                                              # lane-aligned VPU mul
    # masked set-mean over the N slots (factored reduce):
    hidden = jnp.dot(masked, q_ref[...], preferred_element_type=jnp.float32)        # (R, F)
    # Linear over the sequence dim, batched across the block with block-diag W:
    mixed = jnp.dot(wbd_ref[...], hidden, preferred_element_type=jnp.float32)       # (R, F)
    # broadcast back over the N set slots (factored rebroadcast):
    proj = jnp.dot(mixed, qt_ref[...], preferred_element_type=jnp.float32)          # (R, NF)
    # residual add, unmasked lane-dense store
    o_ref[...] = (proj + x).astype(o_ref.dtype)


def _device_params():
    """Generation-aware knobs: (#TensorCores sharing the parallel grid axis,
    MXU row dimension, per-block byte target)."""
    kind = ""
    try:
        kind = jax.devices()[0].device_kind.lower()
    except Exception:
        pass
    is_v5e = ("v5e" in kind) or ("v5 lite" in kind) or ("v5litepod" in kind)
    is_v7 = ("v7" in kind) or ("7x" in kind)
    num_cores = 2 if is_v7 else 1          # v7x: 2 TCs share the "parallel" grid axis
    mxu_rows = 128 if is_v5e else 256      # v5e: 4x128^2 MXU, v6e/v7x: 2x256^2
    # ~4 MiB blocks on single-TC v5e/v6e, ~2 MiB on v7x (halved VMEM, 2 TCs)
    target_block_bytes = (1 << 21) if is_v7 else (1 << 22)
    return num_cores, mxu_rows, target_block_bytes


def _choose_batch_block(B, T, bytes_per_batch, target_bytes, max_rows, num_cores):
    """Pick bb (batches per grid step): divisor of B, bb*T rows <= MXU dim, block under
    the VMEM byte target, and sublane-aligned row blocks.  Single-TC chips take the
    largest feasible bb (grid extent 1 is fine); dual-TC v7x prefers >=2 (ideally even)
    grid extents so both cores stay busy."""
    feasible = []
    for bb in range(1, B + 1):
        if B % bb:
            continue
        if bb * T > max_rows:
            continue
        if bb * bytes_per_batch > target_bytes:
            continue
        if (bb * T) % 8 != 0 and bb != B:
            continue  # keep the row block sublane-aligned (or equal to the full array)
        feasible.append(bb)
    if not feasible:
        return B  # full-array block always satisfies the BlockSpec constraint
    if num_cores >= 2 and B >= 2:
        even = [bb for bb in feasible if (B // bb) % 2 == 0]
        multi = [bb for bb in feasible if (B // bb) >= 2]
        if even:
            return max(even)
        if multi:
            return max(multi)
    return max(feasible)


def temporal_dependencies_pallas(x, mask, w):
    """x: (B,T,N,F); mask: (B,T,N) combined seq-mask * (1/set_size); w: (T,T) -> (B,T,N,F)."""
    B, T, N, F = x.shape
    NF = N * F
    assert w.shape == (T, T), "residual add requires Linear out_size == in_size == T"
    assert NF % 128 == 0, "lane-dense path requires N*F to be a multiple of 128"

    num_cores, mxu_rows, target_block_bytes = _device_params()
    bb = _choose_batch_block(B, T, T * NF * x.dtype.itemsize, target_block_bytes,
                             mxu_rows, num_cores)
    rows = bb * T                 # rows per grid step
    grid = (B // bb,)

    # Wrapper-side reshapes are layout plumbing (row-major contiguous -> free); they
    # present a lane-dense (., N*F) last dim and a flat (B*T) row dim to the kernel.
    x2d = x.reshape(B * T, NF)
    m2d = mask.reshape(B * T, N)

    # Small constant helper matrices, built once per call:
    k_idx = jnp.arange(NF)
    e_n = (k_idx[None, :] // F == jnp.arange(N)[:, None]).astype(jnp.float32)   # (N, NF)
    q = (k_idx[:, None] % F == jnp.arange(F)[None, :]).astype(jnp.float32)      # (NF, F)
    qt = q.T                                                                    # (F, NF)
    w_bd = jnp.kron(jnp.eye(bb, dtype=jnp.float32), w.astype(jnp.float32))      # (rows, rows)

    # VMEM accounting (double-buffered pipeline) and an explicit generation-safe limit.
    itemsize = x.dtype.itemsize
    const_bytes = (rows * rows + N * NF + 2 * NF * F) * 4
    vmem_needed = 2 * (2 * rows * NF * itemsize
                       + rows * N * mask.dtype.itemsize
                       + const_bytes)
    vmem_limit = int(min(max(2 * vmem_needed, 8 << 20), 48 << 20))

    # Advisory cost estimate so XLA schedules surrounding ops around this HBM-bound call.
    flops = 2 * B * T * (N * NF + NF * F + rows * F + F * NF + NF)
    bytes_accessed = (2 * B * T * NF * itemsize
                      + B * T * N * mask.dtype.itemsize
                      + const_bytes)

    out2d = pl.pallas_call(
        temporal_kernel,
        out_shape=jax.ShapeDtypeStruct((B * T, NF), x.dtype),
        grid=grid,
        in_specs=[
            pl.BlockSpec((rows, N), lambda i: (i, 0)),      # mask rows
            pl.BlockSpec((rows, rows), lambda i: (0, 0)),   # block-diagonal W
            pl.BlockSpec((N, NF), lambda i: (0, 0)),        # E_n
            pl.BlockSpec((NF, F), lambda i: (0, 0)),        # Q
            pl.BlockSpec((F, NF), lambda i: (0, 0)),        # Q^T
            pl.BlockSpec((rows, NF), lambda i: (i, 0)),     # x rows (lane-dense)
        ],
        out_specs=pl.BlockSpec((rows, NF), lambda i: (i, 0)),
        compiler_params=pltpu.CompilerParams(
            dimension_semantics=("parallel",),
            vmem_limit_bytes=vmem_limit),
        cost_estimate=pl.CostEstimate(flops=flops, transcendentals=0,
                                      bytes_accessed=bytes_accessed),
    )(m2d, w_bd, e_n, q, qt, x2d)

    return out2d.reshape(B, T, N, F)


def build_masks(batch_seq_length, batch_set_size, B, T, N, dtype=jnp.float32):
    """Host-side glue: builds seq_mask[b,t] * perm_mask[b,t,n] exactly like the
    PyTorch loops, combined into a single (B,T,N) mask (with the 1/set_size folded in)."""
    import numpy as np
    seq_mask = np.zeros((B, T), dtype=np.float32)
    for b, L in enumerate(batch_seq_length):
        seq_mask[b, :L] = 1.0
    perm_mask = np.zeros((B, T, N), dtype=np.float32)
    for b, sizes in enumerate(batch_set_size):
        for t, s in enumerate(sizes):
            assert s >= 1, "set_size must be >= 1 (division by set size)"
            perm_mask[b, t, :s] = 1.0 / s
    return jnp.asarray(seq_mask[:, :, None] * perm_mask, dtype=dtype)


def reference_forward(x, mask, w):
    # pure-JAX reference of the (eval-mode) PyTorch forward
    hidden = jnp.einsum('btn,btnf->btf', mask, x)          # (B,T,F)
    proj = jnp.einsum('ot,btf->bof', w, hidden)            # (B,T_out,F)
    return proj[:, :, None, :] + x


if __name__ == "__main__":
    B, T, N, F = 2, 8, 4, 32   # in_size = out_size = T (required for the residual add)

    key = jax.random.PRNGKey(0)
    kx, kw = jax.random.split(key)
    x = jax.random.normal(kx, (B, T, N, F), dtype=jnp.float32)

    # deterministic Linear(in_size=T, out_size=T, bias=False) weight init
    bound = 1.0 / jnp.sqrt(T)
    w = jax.random.uniform(kw, (T, T), minval=-bound, maxval=bound, dtype=jnp.float32)

    # deterministic "ragged" metadata
    batch_seq_length = [T, 5]
    batch_set_size = [
        [((b + t) % N) + 1 for t in range(T)] for b in range(B)
    ]
    mask = build_masks(batch_seq_length, batch_set_size, B, T, N)

    out = temporal_dependencies_pallas(x, mask, w)
    out = jax.block_until_ready(out)

    ref = reference_forward(x, mask, w)
    assert out.shape == (B, T, N, F)
    assert jnp.allclose(out, ref, atol=1e-5, rtol=1e-5)

    print("KERNEL_OK")
</pallas_src>

<mosaic_0001>
module attributes {stable_mosaic.version = 11 : i64} {
  func.func @temporal_kernel(%arg0: i32, %arg1: memref<16x4xf32, #tpu.memory_space<vmem>>, %arg2: memref<16x16xf32, #tpu.memory_space<vmem>>, %arg3: memref<4x128xf32, #tpu.memory_space<vmem>>, %arg4: memref<128x32xf32, #tpu.memory_space<vmem>>, %arg5: memref<32x128xf32, #tpu.memory_space<vmem>>, %arg6: memref<16x128xf32, #tpu.memory_space<vmem>>, %arg7: memref<16x128xf32, #tpu.memory_space<vmem>>) attributes {dimension_semantics = [#tpu.dimension_semantics<parallel>], iteration_bounds = array<i64: 1>, scalar_prefetch = 0 : i64, scratch_operands = 0 : i64, tpu.core_type = #tpu.core_type<tc>, window_params = [{transform_indices = @transform_0, window_bounds = array<i64: 16, 4>}, {pipeline_mode = #tpu.pipeline_mode<synchronous>, transform_indices = @transform_1, window_bounds = array<i64: 16, 16>}, {pipeline_mode = #tpu.pipeline_mode<synchronous>, transform_indices = @transform_2, window_bounds = array<i64: 4, 128>}, {pipeline_mode = #tpu.pipeline_mode<synchronous>, transform_indices = @transform_3, window_bounds = array<i64: 128, 32>}, {pipeline_mode = #tpu.pipeline_mode<synchronous>, transform_indices = @transform_4, window_bounds = array<i64: 32, 128>}, {transform_indices = @transform_5, window_bounds = array<i64: 16, 128>}, {transform_indices = @transform_6, window_bounds = array<i64: 16, 128>}]} {
    %c0 = arith.constant 0 : index
    %c0_0 = arith.constant 0 : index
    %0 = vector.load %arg6[%c0, %c0_0] : memref<16x128xf32, #tpu.memory_space<vmem>>, vector<16x128xf32>
    %c0_1 = arith.constant 0 : index
    %c0_2 = arith.constant 0 : index
    %1 = vector.load %arg1[%c0_1, %c0_2] : memref<16x4xf32, #tpu.memory_space<vmem>>, vector<16x4xf32>
    %c0_3 = arith.constant 0 : index
    %c0_4 = arith.constant 0 : index
    %2 = vector.load %arg3[%c0_3, %c0_4] : memref<4x128xf32, #tpu.memory_space<vmem>>, vector<4x128xf32>
    %cst = arith.constant dense<0.000000e+00> : vector<16x128xf32>
    %3 = tpu.matmul %1, %2, %cst {dimension_numbers = #tpu.dot_dimension_numbers<[1], [0], [0], [1], [0, 0, 1, 1], [], []>} : vector<16x4xf32>, vector<4x128xf32>, vector<16x128xf32> -> vector<16x128xf32>
    %4 = arith.mulf %3, %0 : vector<16x128xf32>
    %c0_5 = arith.constant 0 : index
    %c0_6 = arith.constant 0 : index
    %5 = vector.load %arg4[%c0_5, %c0_6] : memref<128x32xf32, #tpu.memory_space<vmem>>, vector<128x32xf32>
    %cst_7 = arith.constant dense<0.000000e+00> : vector<16x32xf32>
    %6 = tpu.matmul %4, %5, %cst_7 {dimension_numbers = #tpu.dot_dimension_numbers<[1], [0], [0], [1], [0, 0, 1, 1], [], []>} : vector<16x128xf32>, vector<128x32xf32>, vector<16x32xf32> -> vector<16x32xf32>
    %c0_8 = arith.constant 0 : index
    %c0_9 = arith.constant 0 : index
    %7 = vector.load %arg2[%c0_8, %c0_9] : memref<16x16xf32, #tpu.memory_space<vmem>>, vector<16x16xf32>
    %cst_10 = arith.constant dense<0.000000e+00> : vector<16x32xf32>
    %8 = tpu.matmul %7, %6, %cst_10 {dimension_numbers = #tpu.dot_dimension_numbers<[1], [0], [0], [1], [0, 0, 1, 1], [], []>} : vector<16x16xf32>, vector<16x32xf32>, vector<16x32xf32> -> vector<16x32xf32>
    %c0_11 = arith.constant 0 : index
    %c0_12 = arith.constant 0 : index
    %9 = vector.load %arg5[%c0_11, %c0_12] : memref<32x128xf32, #tpu.memory_space<vmem>>, vector<32x128xf32>
    %cst_13 = arith.constant dense<0.000000e+00> : vector<16x128xf32>
    %10 = tpu.matmul %8, %9, %cst_13 {dimension_numbers = #tpu.dot_dimension_numbers<[1], [0], [0], [1], [0, 0, 1, 1], [], []>} : vector<16x32xf32>, vector<32x128xf32>, vector<16x128xf32> -> vector<16x128xf32>
    %11 = arith.addf %10, %0 : vector<16x128xf32>
    %c0_14 = arith.constant 0 : index
    %c0_15 = arith.constant 0 : index
    %12 = vector.load %arg7[%c0_14, %c0_15] : memref<16x128xf32, #tpu.memory_space<vmem>>, vector<16x128xf32>
    tpu.vector_store %arg7[%c0_14, %c0_15], %11 {strides = array<i32>} : memref<16x128xf32, #tpu.memory_space<vmem>>, vector<16x128xf32>,
    return
  }
  func.func @transform_0(%arg0: i32) -> (i32, i32) {
    %c0_i32 = arith.constant 0 : i32
    %c0_i32_0 = arith.constant 0 : i32
    return %arg0, %c0_i32 : i32, i32
  }
  func.func @transform_1(%arg0: i32) -> (i32, i32) {
    %c0_i32 = arith.constant 0 : i32
    %c0_i32_0 = arith.constant 0 : i32
    %c0_i32_1 = arith.constant 0 : i32
    return %c0_i32, %c0_i32_0 : i32, i32
  }
  func.func @transform_2(%arg0: i32) -> (i32, i32) {
    %c0_i32 = arith.constant 0 : i32
    %c0_i32_0 = arith.constant 0 : i32
    %c0_i32_1 = arith.constant 0 : i32
    return %c0_i32, %c0_i32_0 : i32, i32
  }
  func.func @transform_3(%arg0: i32) -> (i32, i32) {
    %c0_i32 = arith.constant 0 : i32
    %c0_i32_0 = arith.constant 0 : i32
    %c0_i32_1 = arith.constant 0 : i32
    return %c0_i32, %c0_i32_0 : i32, i32
  }
  func.func @transform_4(%arg0: i32) -> (i32, i32) {
    %c0_i32 = arith.constant 0 : i32
    %c0_i32_0 = arith.constant 0 : i32
    %c0_i32_1 = arith.constant 0 : i32
    return %c0_i32, %c0_i32_0 : i32, i32
  }
  func.func @transform_5(%arg0: i32) -> (i32, i32) {
    %c0_i32 = arith.constant 0 : i32
    %c0_i32_0 = arith.constant 0 : i32
    return %arg0, %c0_i32 : i32, i32
  }
  func.func @transform_6(%arg0: i32) -> (i32, i32) {
    %c0_i32 = arith.constant 0 : i32
    %c0_i32_0 = arith.constant 0 : i32
    return %arg0, %c0_i32 : i32, i32
  }
}

</mosaic_0001>

<bundles_post_ra>
// kernel: tpu_custom_call.1
= control target key start
LH: loop header
LB: loop body
LE: loop exit
PB: predicated region body
PF: predicated region fallthrough
CT: control target
= control target key end

     0   :  { %vm36_vm0 = vcmask 1043456   ;;  %vm29_vm1 = vcmask 31744   ;;  %s641_s0 = inlined_call_operand.vmem [shape: f32[16,4], index: 0, kind: input, shape index: {}]   ;;  %s642_s1 = inlined_call_operand.vmem [shape: f32[16,16], index: 1, kind: input, shape index: {}]   ;;  %s643_s2 = inlined_call_operand.vmem [shape: f32[4,128], index: 2, kind: input, shape index: {}]   ;;  %s644_s3 = inlined_call_operand.vmem [shape: f32[128,32], index: 3, kind: input, shape index: {}]   ;;  %s645_s4 = inlined_call_operand.vmem [shape: f32[32,128], index: 4, kind: input, shape index: {}]   ;;  %s646_s5 = inlined_call_operand.vmem [shape: f32[16,128], index: 5, kind: input, shape index: {}]   ;;  %s647_s6 = inlined_call_operand.hbm [shape: f32[16,128], index: 6, kind: output, shape index: {}]  }
   0x1   :  { %v28_v0 = vld [vmem:[%s643_s2] sm:$0xf]  ;;  %v27_v1 = vld [vmem:[%s641_s0 + $0x8] sm:$0xff]  ;;  %v132_v2 = vld [vmem:[%s644_s3 + $0x78] sm:$0xff] }
   0x2   :  { %434 = vmatprep.subr.msk.mxu0 %vm36_vm0, %v28_v0  ;;  %439 = vmatprep.subr.mxu1 %v132_v2  ;;  %v131_v3 = vld [vmem:[%s644_s3 + $0x70] sm:$0xff]  ;;  %v130_v4 = vld [vmem:[%s644_s3 + $0x68] sm:$0xff]  ;;  %v129_v5 = vld [vmem:[%s644_s3 + $0x60] sm:$0xff] }
   0x3   :  { %435 = vmatpush3.msk.msra.mxu0 %vm36_vm0, %v28_v0  ;;  %440 = vmatpush3.msra.mxu1 %v132_v2  ;;  %v128_v6 = vld [vmem:[%s644_s3 + $0x58] sm:$0xff] }
   0x4   :  { %437 = vmatmul.mubr.msk.f32.vlgmr.msra.gmra.mxu0 %vm29_vm1, %v27_v1  ;;  %441 = vmatprep.subr.mxu1 %v131_v3 }
   0x5   :  { %442 = vmatpush3.msra.mxu1 %v131_v3 }
   0x6   :  { %443 = vmatprep.subr.mxu1 %v130_v4 }
   0x7   :  { %444 = vmatpush3.msra.mxu1 %v130_v4 }
   0x8   :  { %11 = vsyncpa [#allocation3], 0  ;;  %445 = vmatprep.subr.mxu1 %v129_v5  ;;  %v127_v7 = vld [vmem:[%s644_s3 + $0x50] sm:$0xff]  ;;  %v126_v8 = vld [vmem:[%s644_s3 + $0x48] sm:$0xff]  ;;  %vm210_vm2 = vcmask 130048   ;;  %vm296_vm3 = vcmask 261120  }
   0x9   :  { %446 = vmatpush3.msra.mxu1 %v129_v5  ;;  %v125_v9 = vld [vmem:[%s644_s3 + $0x40] sm:$0xff]  ;;  %v124_v10 = vld [vmem:[%s644_s3 + $0x38] sm:$0xff]  ;;  %v123_v11 = vld [vmem:[%s644_s3 + $0x30] sm:$0xff]  ;;  %s517_s22 = smov [#allocation2]  }
   0xa   :  { %447 = vmatprep.subr.mxu1 %v128_v6  ;;  %v122_v12 = vld [vmem:[%s644_s3 + $0x28] sm:$0xff]  ;;  %v121_v13 = vld [vmem:[%s644_s3 + $0x20] sm:$0xff]  ;;  %v120_v14 = vld [vmem:[%s644_s3 + $0x18] sm:$0xff]  ;;  %s385_s23 = sshll.u32 %s517_s22, 4  ;;  %s386_s23 = int_to_ptr.vmem [resolvable:$true] %s385_s23 }
   0xb   :  { %448 = vmatpush3.msra.mxu1 %v128_v6  ;;  %v119_v15 = vld [vmem:[%s644_s3 + $0x10] sm:$0xff]  ;;  %v118_v16 = vld [vmem:[%s644_s3 + $0x8] sm:$0xff]  ;;  %v117_v17 = vld [vmem:[%s644_s3] sm:$0xff]  ;;  %p500_p1 = scmp.lt.s32.totalorder %s386_s23, %s386_s23 }
   0xc   :  { %449 = vmatprep.subr.mxu1 %v127_v7  ;;  %v26_v18 = vld [vmem:[%s641_s0] sm:$0xff]  ;;  %v25_v19 = vld [vmem:[%s646_s5 + $0x8] sm:$0xff]  ;;  %v295_v26 = vld [vmem:[%s645_s4 + $0x18] sm:$0xff] }
   0xd   :  { %450 = vmatpush3.msra.mxu1 %v127_v7  ;;  %436 = vmatprep.mubr.msk.f32.mxu1 %vm29_vm1, %v26_v18  ;;  %v208_v22 = vld [vmem:[%s642_s1] sm:$0xff]  ;;  %v209_v25 = vld [vmem:[%s642_s1 + $0x8] sm:$0xff]  ;;  %v294_v27 = vld [vmem:[%s645_s4 + $0x10] sm:$0xff] }
   0xe   :  { %451 = vmatprep.subr.mxu1 %v126_v8  ;;  %478 = vmatprep.mubr.msk.f32.mxu0 %vm210_vm2, %v208_v22  ;;  %v293_v28 = vld [vmem:[%s645_s4 + $0x8] sm:$0xff]  ;;  %v292_v29 = vld [vmem:[%s645_s4] sm:$0xff]  ;;  %s495_s4 = scalar_lea.vmem %s386_s23, 256 }
   0xf   :  { %452 = vmatpush3.msra.mxu1 %v126_v8  ;;  %v24_v31 = vld [vmem:[%s646_s5] sm:$0xff]  ;;  %p496_p0 = scmp.ne.s32.totalorder %s386_s23, %s495_s4  ;;  %p501_p2 = scmp.lt.s32.totalorder %s495_s4, %s495_s4 }
  0x10   :  { %453 = vmatprep.subr.mxu1 %v125_v9 }
  0x11   :  { %454 = vmatpush3.msra.mxu1 %v125_v9  ;;  %p502_p3 = por %p501_p2, %p500_p1 }
  0x12   :  { %455 = vmatprep.subr.mxu1 %v124_v10 }
  0x13   :  { %456 = vmatpush3.msra.mxu1 %v124_v10  ;;  %p503_p4 = pnand %p502_p3, %p496_p0 }
  0x14   :  { %457 = vmatprep.subr.mxu1 %v123_v11 }
  0x15   :  { %458 = vmatpush3.msra.mxu1 %v123_v11 }
  0x16   :  { %459 = vmatprep.subr.mxu1 %v122_v12 }
  0x17   :  { %460 = vmatpush3.msra.mxu1 %v122_v12 }
  0x18   :  { %461 = vmatprep.subr.mxu1 %v121_v13 }
  0x19   :  { %462 = vmatpush3.msra.mxu1 %v121_v13 }
  0x1a   :  { %463 = vmatprep.subr.mxu1 %v120_v14 }
  0x1b   :  { %464 = vmatpush3.msra.mxu1 %v120_v14 }
  0x1c   :  { %465 = vmatprep.subr.mxu1 %v119_v15 }
  0x1d   :  { %466 = vmatpush3.msra.mxu1 %v119_v15 }
  0x1e   :  { %467 = vmatprep.subr.mxu1 %v118_v16 }
  0x1f   :  { %468 = vmatpush3.msra.mxu1 %v118_v16 }
  0x20   :  { %469 = vmatprep.subr.mxu1 %v117_v17 }
  0x21   :  { %470 = vmatpush3.msra.mxu1 %v117_v17 }
  0xc4   :  { %v438_v20 = vpop.f32.mrf.mxu0 }
  0xc5   :  { %v116_v21 = vmul.f32 %v438_v20, %v25_v19 }
  0xc6   :  { %v106_v30 = vpop.f32.mrf.mxu0 }
  0xc7   :  { %472 = vmatmul.mubr.f32.vlgmr.msra.gmra.mxu1 %v116_v21  ;;  %v115_v34 = vmul.f32 %v106_v30, %v24_v31 }
 0x187   :  { %v473_v23 = vpop.f32.mrf.mxu1 }
 0x188   :  { %474 = vmatprep.subr.mxu0 %v473_v23 }
 0x189   :  { %v199_v24 = vpop.f32.mrf.mxu1  ;;  %475 = vmatpush3.msra.mxu0 %v473_v23 }
 0x18a   :  { %476 = vmatprep.subr.mxu0 %v199_v24 }
 0x18b   :  { %477 = vmatpush3.msra.mxu0 %v199_v24 }
 0x18c   :  { %479 = vmatmul.mubr.msk.f32.vlgmr.msra.gmra.mxu0 %vm210_vm2, %v209_v25  ;;  %481 = vmatprep.subr.mxu0 %v295_v26 }
 0x18d   :  { %482 = vmatpush3.msra.mxu0 %v295_v26 }
 0x18e   :  { %483 = vmatprep.subr.mxu0 %v294_v27 }
 0x18f   :  { %484 = vmatpush3.msra.mxu0 %v294_v27 }
 0x190   :  { %485 = vmatprep.subr.mxu0 %v293_v28 }
 0x191   :  { %486 = vmatpush3.msra.mxu0 %v293_v28 }
 0x192   :  { %487 = vmatprep.subr.mxu0 %v292_v29 }
 0x193   :  { %488 = vmatpush3.msra.mxu0 %v292_v29 }
 0x24c   :  { %v480_v32 = vpop.f32.mrf.mxu0 }
 0x24e   :  { %v283_v33 = vpop.f32.mrf.mxu0 }
 0x24f   :  { %489 = vmatprep.mubr.msk.f32.mxu0 %vm296_vm3, %v283_v33 }
 0x250   :  { %490 = vmatmul.mubr.msk.f32.vlgmr.msra.gmra.mxu0 %vm296_vm3, %v480_v32 }
 0x251   :  { %471 = vmatprep.mubr.f32.mxu0 %v115_v34 }
 0x310   :  { %v491_v35 = vpop.f32.mrf.mxu0 }
 0x311   :  { %v375_v36 = vadd.f32 %v491_v35, %v25_v19 }
 0x312   :  { %v369_v37 = vpop.f32.mrf.mxu0 }
 0x313   :  { %379 = vst [vmem:[#allocation2 + $0x8] sm:$0xff] %v375_v36  ;;  %v370_v38 = vadd.f32 %v369_v37, %v24_v31 }
 0x315   :  { %378 = vst [vmem:[#allocation2] sm:$0xff] %v370_v38 }
 0x316   :  { %506 = shalt.err (!%p503_p4)
}
 0x317   :  { %s518_s5 = smov 128   ;;  %s519_s24 = smov 8  }
 0x318   :  { %391 = dma.vmem_to_hbm [thread:$0]  %s386_s23, 256, %s647_s6, [#allocation3], %s518_s5, %s518_s5, %s519_s24  }
 0x319   :  { %515 = dma.done.wait [#allocation3], 256  }
 0x31a   :  { %516 = vsyncadd [#allocation3], 4294967040 }
 0x31b   :  { %395 = vsyncpa [#allocation3], 1 }

</bundles_post_ra>
